<compile_context>
chip_gen: v5e
topology: v5e:2x2
jax: 0.10.0
libtpu: 0.0.40
codegen_flags: <defaults>
</compile_context>

<pallas_src>
import functools

import jax
import jax.numpy as jnp
from jax.experimental import pallas as pl
from jax.experimental.pallas import tpu as pltpu


# --------------------------- hardware-aware sizing ----------------------------


def _vmem_capacity_bytes():
    try:
        info = pltpu.get_tpu_info()
        cap = getattr(info, "vmem_capacity_bytes", None)
        if cap:
            return int(cap)
    except Exception:
        pass
    return 128 * 1024 * 1024  # v5e / v6e default


_VMEM_CAPACITY = _vmem_capacity_bytes()
# ~75% of physical VMEM: leaves headroom for Mosaic internal scratch and the
# double-buffered BlockSpec buffers (≈48 MiB on v7x, ≈96 MiB on v5e/v6e).
_VMEM_LIMIT_BYTES = int(_VMEM_CAPACITY * 3 // 4)
# Per-x-tile budget: large tiles amortize the ~0.35us/step overhead and reach the
# HBM roofline.  v7x (64 MiB VMEM) -> 4 MiB, v5e/v6e -> 7 MiB.
_DEFAULT_BLOCK_BUDGET = (4 * 1024 * 1024 if _VMEM_CAPACITY <= 64 * 1024 * 1024
                         else 7 * 1024 * 1024)
# Fused (x-resident-in-VMEM) single-pass path threshold on total input bytes
# (factor 6 covers in + out + f32 temporaries).
_FUSED_X_LIMIT = _VMEM_LIMIT_BYTES // 6


# --------------------------------- kernels ------------------------------------


def _fused_ncl_kernel(*refs, num_t, eps, inv_count):
    """Single-pass path: x resident in VMEM; two-pass mean/var, then normalize."""
    x_refs = refs[:num_t]                       # each (N, C, L)
    g = refs[num_t][...][None, :, :]            # (1, C, 1) f32
    b = refs[num_t + 1][...][None, :, :]
    y_refs = refs[num_t + 2:]
    for t in range(num_t):
        x = x_refs[t][...].astype(jnp.float32)
        mean = jnp.sum(jnp.sum(x, axis=2, keepdims=True), axis=0,
                       keepdims=True) * inv_count
        d = x - mean
        var = jnp.sum(jnp.sum(d * d, axis=2, keepdims=True), axis=0,
                      keepdims=True) * inv_count
        scale = g * jax.lax.rsqrt(var + eps)
        y_refs[t][...] = (d * scale + b).astype(y_refs[t].dtype)


def _stats_ncl_kernel(*refs, num_t, eps, inv_count, acc_lanes):
    """Tiled pass 1: accumulate per-channel sum/sumsq; finalize scale/shift.

    Grid = (channel_block["parallel"], batch["arbitrary"], lane["arbitrary"]).
    Per-tile work is folded down to compact (TCb, acc_lanes) accumulators; the
    one cross-lane reduce + gamma/beta fold happens once in the finalize.
    """
    x_refs = refs[:num_t]                                   # (NB, TCb, TL)
    g_ref = refs[num_t]                                     # (TCb, 1) f32
    b_ref = refs[num_t + 1]
    out_refs = refs[num_t + 2: num_t + 2 + 2 * num_t]       # scale0, shift0, ...
    acc_refs = refs[num_t + 2 + 2 * num_t:]                 # sum0, sq0, ...

    first = jnp.logical_and(pl.program_id(1) == 0, pl.program_id(2) == 0)
    last = jnp.logical_and(pl.program_id(1) == pl.num_programs(1) - 1,
                           pl.program_id(2) == pl.num_programs(2) - 1)

    @pl.when(first)
    def _():
        for a in acc_refs:
            a[...] = jnp.zeros_like(a)

    for t in range(num_t):
        x = x_refs[t][...].astype(jnp.float32)              # (NB, TCb, TL)
        if x.shape[-1] != acc_lanes:
            # Fold lanes down to 128 while reducing the batch dim (reviewer item:
            # compact (C,128) accumulators instead of (C,TL)).
            x4 = x.reshape(x.shape[0], x.shape[1], x.shape[2] // acc_lanes,
                           acc_lanes)
            s = jnp.sum(x4, axis=(0, 2))
            q = jnp.sum(x4 * x4, axis=(0, 2))
        else:
            s = jnp.sum(x, axis=0)
            q = jnp.sum(x * x, axis=0)
        acc_refs[2 * t][...] += s
        acc_refs[2 * t + 1][...] += q

    @pl.when(last)
    def _():
        g = g_ref[...]
        b = b_ref[...]
        for t in range(num_t):
            s = jnp.sum(acc_refs[2 * t][...], axis=1, keepdims=True)       # (TCb,1)
            q = jnp.sum(acc_refs[2 * t + 1][...], axis=1, keepdims=True)
            mean = s * inv_count
            # Biased variance (PyTorch training mode); clamp guards cancellation.
            var = jnp.maximum(q * inv_count - mean * mean, 0.0)
            scale = g * jax.lax.rsqrt(var + eps)
            out_refs[2 * t][...] = scale
            out_refs[2 * t + 1][...] = b - mean * scale


def _normalize_ncl_kernel(*refs, num_t):
    """Tiled pass 2: y = x * scale + shift (bandwidth bound, 2 VALU ops/elem)."""
    x_refs = refs[:num_t]                                   # (NB, C, TL)
    ss_refs = refs[num_t: 3 * num_t]                        # scale0, shift0, ...
    y_refs = refs[3 * num_t:]
    for t in range(num_t):
        x = x_refs[t][...].astype(jnp.float32)
        scale = ss_refs[2 * t][...][None, :, :]             # (1, C, 1)
        shift = ss_refs[2 * t + 1][...][None, :, :]
        y_refs[t][...] = (x * scale + shift).astype(y_refs[t].dtype)


def _fused_nc_kernel(*refs, num_t, eps, inv_count):
    """2D (N, C) single-pass path, C on lanes."""
    x_refs = refs[:num_t]                                   # (N, C)
    g = refs[num_t][...]                                    # (1, C)
    b = refs[num_t + 1][...]
    y_refs = refs[num_t + 2:]
    for t in range(num_t):
        x = x_refs[t][...].astype(jnp.float32)
        mean = jnp.sum(x, axis=0, keepdims=True) * inv_count
        d = x - mean
        var = jnp.sum(d * d, axis=0, keepdims=True) * inv_count
        scale = g * jax.lax.rsqrt(var + eps)
        y_refs[t][...] = (d * scale + b).astype(y_refs[t].dtype)


def _stats_nc_kernel(*refs, num_t, eps, inv_count):
    """2D tiled pass 1: per-channel sums over row tiles; finalize scale/shift."""
    x_refs = refs[:num_t]                                   # (TN, C)
    g_ref = refs[num_t]                                     # (1, C)
    b_ref = refs[num_t + 1]
    out_refs = refs[num_t + 2: num_t + 2 + 2 * num_t]
    acc_refs = refs[num_t + 2 + 2 * num_t:]                 # (1, C) f32

    first = pl.program_id(0) == 0
    last = pl.program_id(0) == pl.num_programs(0) - 1

    @pl.when(first)
    def _():
        for a in acc_refs:
            a[...] = jnp.zeros_like(a)

    for t in range(num_t):
        x = x_refs[t][...].astype(jnp.float32)
        acc_refs[2 * t][...] += jnp.sum(x, axis=0, keepdims=True)
        acc_refs[2 * t + 1][...] += jnp.sum(x * x, axis=0, keepdims=True)

    @pl.when(last)
    def _():
        g = g_ref[...]
        b = b_ref[...]
        for t in range(num_t):
            mean = acc_refs[2 * t][...] * inv_count
            var = jnp.maximum(acc_refs[2 * t + 1][...] * inv_count - mean * mean,
                              0.0)
            scale = g * jax.lax.rsqrt(var + eps)
            out_refs[2 * t][...] = scale
            out_refs[2 * t + 1][...] = b - mean * scale


def _normalize_nc_kernel(*refs, num_t):
    """2D tiled pass 2: y = x * scale + shift, lane-dense (C on lanes)."""
    x_refs = refs[:num_t]
    ss_refs = refs[num_t: 3 * num_t]
    y_refs = refs[3 * num_t:]
    for t in range(num_t):
        x = x_refs[t][...].astype(jnp.float32)
        y_refs[t][...] = (x * ss_refs[2 * t][...]
                          + ss_refs[2 * t + 1][...]).astype(y_refs[t].dtype)


# ------------------------------ tile choosers ----------------------------------


def _choose_lane_tile(L, C, itemsize, budget):
    """Largest multiple-of-128 tile dividing L within the per-block budget."""
    max_tl = max(128, budget // max(1, C * itemsize))
    tl = 128
    cand = 256
    stop = min(L, max_tl)
    while cand <= stop:
        if L % cand == 0:
            tl = cand
        cand += 128
    return tl


def _choose_batch_tile(N, C, TL, itemsize, budget):
    """Largest divisor of N keeping the (NB, C, TL) block within the budget."""
    cap = max(1, budget // max(1, C * TL * itemsize))
    cap = min(cap, N)
    for nb in range(cap, 0, -1):
        if N % nb == 0:
            return nb
    return 1


def _choose_row_tile(N, C, itemsize, budget):
    """Row tile for (N, C): multiple of 8 (or full N); returns (TN, needs_pad)."""
    cap = budget // max(1, C * itemsize)
    if N <= max(cap, 8):
        return N, False                       # single full row-block (always legal)
    cap8 = max(8, (cap // 8) * 8)
    lim = min(cap8, N)
    for tn in range(lim - lim % 8, 7, -8):
        if N % tn == 0:
            return tn, False
    return max(8, min(cap8, 1024)), True      # no clean divisor: pad N


# -------------------------------- wrappers -------------------------------------


def _bn_ncl(xs, gamma, beta, eps, force_tiled=False, block_budget=None):
    """Training-mode BatchNorm1d over a list of same-shape (N, C, L) tensors."""
    num_t = len(xs)
    N, C, L = xs[0].shape
    out_dtype = xs[0].dtype
    itemsize = jnp.dtype(out_dtype).itemsize
    budget = block_budget or _DEFAULT_BLOCK_BUDGET
    inv_count = 1.0 / float(N * L)

    g = gamma.reshape(C, 1).astype(jnp.float32)
    b = beta.reshape(C, 1).astype(jnp.float32)

    # ---- fused single-pass fast path (x resident in VMEM: 2x HBM traffic) -----
    x_bytes = num_t * N * C * L * itemsize
    if not force_tiled and x_bytes <= _FUSED_X_LIMIT:
        full_spec = pl.BlockSpec((N, C, L), lambda i: (0, 0, 0))
        cvec_spec = pl.BlockSpec((C, 1), lambda i: (0, 0))
        ys = pl.pallas_call(
            functools.partial(_fused_ncl_kernel, num_t=num_t, eps=float(eps),
                              inv_count=inv_count),
            out_shape=tuple(jax.ShapeDtypeStruct((N, C, L), out_dtype)
                            for _ in xs),
            grid_spec=pltpu.PrefetchScalarGridSpec(
                num_scalar_prefetch=0, grid=(1,),
                in_specs=[full_spec] * num_t + [cvec_spec, cvec_spec],
                out_specs=tuple(full_spec for _ in xs)),
            compiler_params=pltpu.CompilerParams(
                dimension_semantics=("arbitrary",),
                vmem_limit_bytes=_VMEM_LIMIT_BYTES),
        )(*xs, g, b)
        return list(ys)

    # ---- tiled two-pass path ---------------------------------------------------
    # Lane alignment: multiple-of-128 lane tiles; if L is not a multiple of 128,
    # use a single lane block when it fits, else zero-pad L (zeros are harmless
    # for sum/sumsq since inv_count uses the true N*L; pad is sliced off).
    L_pad, xs_in = L, list(xs)
    if L % 128 != 0:
        if C * L * itemsize <= budget:
            TL = L
        else:
            L_pad = ((L + 127) // 128) * 128
            xs_in = [jnp.pad(x, ((0, 0), (0, 0), (0, L_pad - L))) for x in xs]
            TL = _choose_lane_tile(L_pad, C, itemsize, budget)
    else:
        TL = _choose_lane_tile(L, C, itemsize, budget)
    NB = _choose_batch_tile(N, C, TL, itemsize, budget)
    nn, nl = N // NB, L_pad // TL

    # Split the channel axis into a leading "parallel" grid axis so v7x's second
    # TensorCore shares the stats work (no-op on single-core v5e/v6e).
    if C % 16 == 0 and C >= 16:
        nc, TCb = 2, C // 2
    else:
        nc, TCb = 1, C
    acc_lanes = 128 if TL % 128 == 0 else TL

    # ---- pass 1: statistics -> per-channel scale / shift -----------------------
    x_stats_spec = pl.BlockSpec((NB, TCb, TL), lambda c, n, l: (n, c, l))
    cvec_stats_spec = pl.BlockSpec((TCb, 1), lambda c, n, l: (c, 0))
    scale_shift = pl.pallas_call(
        functools.partial(_stats_ncl_kernel, num_t=num_t, eps=float(eps),
                          inv_count=inv_count, acc_lanes=acc_lanes),
        out_shape=tuple(jax.ShapeDtypeStruct((C, 1), jnp.float32)
                        for _ in range(2 * num_t)),
        grid_spec=pltpu.PrefetchScalarGridSpec(
            num_scalar_prefetch=0,
            grid=(nc, nn, nl),
            in_specs=[x_stats_spec] * num_t + [cvec_stats_spec, cvec_stats_spec],
            out_specs=tuple(cvec_stats_spec for _ in range(2 * num_t)),
            scratch_shapes=[pltpu.VMEM((TCb, acc_lanes), jnp.float32)
                            for _ in range(2 * num_t)]),
        compiler_params=pltpu.CompilerParams(
            dimension_semantics=("parallel", "arbitrary", "arbitrary"),
            vmem_limit_bytes=_VMEM_LIMIT_BYTES),
    )(*xs_in, g, b)

    # ---- pass 2: normalize ------------------------------------------------------
    # (If xprof ever shows exposed DMA here, bump x_spec to pipeline_mode=
    # pl.Buffered(3); tiles are already budget-maxed so default depth suffices.)
    x_spec = pl.BlockSpec((NB, C, TL), lambda n, l: (n, 0, l))
    cvec_spec = pl.BlockSpec((C, 1), lambda n, l: (0, 0))   # resident across grid
    ys = pl.pallas_call(
        functools.partial(_normalize_ncl_kernel, num_t=num_t),
        out_shape=tuple(jax.ShapeDtypeStruct((N, C, L_pad), out_dtype)
                        for _ in xs),
        grid_spec=pltpu.PrefetchScalarGridSpec(
            num_scalar_prefetch=0,
            grid=(nn, nl),
            in_specs=[x_spec] * num_t + [cvec_spec] * (2 * num_t),
            out_specs=tuple(x_spec for _ in xs)),
        compiler_params=pltpu.CompilerParams(
            dimension_semantics=("parallel", "parallel"),
            vmem_limit_bytes=_VMEM_LIMIT_BYTES),
    )(*xs_in, *scale_shift)
    ys = list(ys)
    if L_pad != L:
        ys = [y[:, :, :L] for y in ys]
    return ys


def _bn_nc(xs, gamma, beta, eps, force_tiled=False, block_budget=None):
    """Training-mode BatchNorm1d over (N, C) tensors with C on the lane axis."""
    num_t = len(xs)
    N, C = xs[0].shape
    out_dtype = xs[0].dtype
    itemsize = jnp.dtype(out_dtype).itemsize
    budget = block_budget or _DEFAULT_BLOCK_BUDGET
    inv_count = 1.0 / float(N)

    g = gamma.reshape(1, C).astype(jnp.float32)
    b = beta.reshape(1, C).astype(jnp.float32)

    # ---- fused single-pass fast path -------------------------------------------
    x_bytes = num_t * N * C * itemsize
    if not force_tiled and x_bytes <= _FUSED_X_LIMIT:
        full_spec = pl.BlockSpec((N, C), lambda i: (0, 0))
        cvec_spec = pl.BlockSpec((1, C), lambda i: (0, 0))
        ys = pl.pallas_call(
            functools.partial(_fused_nc_kernel, num_t=num_t, eps=float(eps),
                              inv_count=inv_count),
            out_shape=tuple(jax.ShapeDtypeStruct((N, C), out_dtype) for _ in xs),
            grid_spec=pltpu.PrefetchScalarGridSpec(
                num_scalar_prefetch=0, grid=(1,),
                in_specs=[full_spec] * num_t + [cvec_spec, cvec_spec],
                out_specs=tuple(full_spec for _ in xs)),
            compiler_params=pltpu.CompilerParams(
                dimension_semantics=("arbitrary",),
                vmem_limit_bytes=_VMEM_LIMIT_BYTES),
        )(*xs, g, b)
        return list(ys)

    # ---- tiled two-pass path -----------------------------------------------------
    TN, need_pad = _choose_row_tile(N, C, itemsize, budget)
    xs_in, N_pad = list(xs), N
    if need_pad or N % TN != 0:
        N_pad = ((N + TN - 1) // TN) * TN
        xs_in = [jnp.pad(x, ((0, N_pad - N), (0, 0))) for x in xs]
    nn = N_pad // TN

    x_spec = pl.BlockSpec((TN, C), lambda n: (n, 0))
    cvec_spec = pl.BlockSpec((1, C), lambda n: (0, 0))      # resident across grid

    scale_shift = pl.pallas_call(
        functools.partial(_stats_nc_kernel, num_t=num_t, eps=float(eps),
                          inv_count=inv_count),
        out_shape=tuple(jax.ShapeDtypeStruct((1, C), jnp.float32)
                        for _ in range(2 * num_t)),
        grid_spec=pltpu.PrefetchScalarGridSpec(
            num_scalar_prefetch=0, grid=(nn,),
            in_specs=[x_spec] * num_t + [cvec_spec, cvec_spec],
            out_specs=tuple(cvec_spec for _ in range(2 * num_t)),
            scratch_shapes=[pltpu.VMEM((1, C), jnp.float32)
                            for _ in range(2 * num_t)]),
        compiler_params=pltpu.CompilerParams(
            dimension_semantics=("arbitrary",),
            vmem_limit_bytes=_VMEM_LIMIT_BYTES),
    )(*xs_in, g, b)

    ys = pl.pallas_call(
        functools.partial(_normalize_nc_kernel, num_t=num_t),
        out_shape=tuple(jax.ShapeDtypeStruct((N_pad, C), out_dtype) for _ in xs),
        grid_spec=pltpu.PrefetchScalarGridSpec(
            num_scalar_prefetch=0, grid=(nn,),
            in_specs=[x_spec] * num_t + [cvec_spec] * (2 * num_t),
            out_specs=tuple(x_spec for _ in xs)),
        compiler_params=pltpu.CompilerParams(
            dimension_semantics=("parallel",),
            vmem_limit_bytes=_VMEM_LIMIT_BYTES),
    )(*xs_in, *scale_shift)
    ys = list(ys)
    if N_pad != N:
        ys = [y[:N] for y in ys]
    return ys


def _bn_forward(xs, gamma, beta, eps, force_tiled=False, block_budget=None):
    nd = xs[0].ndim
    if nd == 3:
        return _bn_ncl(xs, gamma, beta, eps, force_tiled, block_budget)
    if nd == 2:
        return _bn_nc(xs, gamma, beta, eps, force_tiled, block_budget)
    raise ValueError("BatchNorm1d expects 2D (N, C) or 3D (N, C, L) input")


def cd_batch_norm(x, gamma, beta, eps=1e-5, *, force_tiled=False,
                  block_budget_bytes=None):
    """Forward of CD_BatchNorm: handles dict {'rel','irrel'} or a plain array."""
    if isinstance(x, dict):
        xr, xi = x["rel"], x["irrel"]
        if xr.shape == xi.shape and xr.dtype == xi.dtype:
            yr, yi = _bn_forward([xr, xi], gamma, beta, eps, force_tiled,
                                 block_budget_bytes)
        else:
            yr = _bn_forward([xr], gamma, beta, eps, force_tiled,
                             block_budget_bytes)[0]
            yi = _bn_forward([xi], gamma, beta, eps, force_tiled,
                             block_budget_bytes)[0]
        return {"rel": yr, "irrel": yi}
    return _bn_forward([x], gamma, beta, eps, force_tiled, block_budget_bytes)[0]


# ----------------------------- reference & tests -------------------------------


def _reference_bn(x, gamma, beta, eps=1e-5):
    """Pure-JAX reference: training-mode BatchNorm1d over (N,C,L) or (N,C)."""
    axes = (0, 2) if x.ndim == 3 else (0,)
    mean = jnp.mean(x, axis=axes, keepdims=True)
    var = jnp.mean((x - mean) ** 2, axis=axes, keepdims=True)
    shape = (1, -1, 1) if x.ndim == 3 else (1, -1)
    return ((x - mean) * jax.lax.rsqrt(var + eps) * gamma.reshape(shape)
            + beta.reshape(shape))


if __name__ == "__main__":
    key = jax.random.PRNGKey(0)
    k1, k2, k3, k4, k5, k6, k7, k8 = jax.random.split(key, 8)
    eps = 1e-5

    # --- 1) dict input, 3D (N, C, L), small -> fused single-pass path ----------
    N, C, L = 2, 4, 16
    gamma = 1.0 + 0.1 * jax.random.normal(k3, (C,), dtype=jnp.float32)
    beta = 0.1 * jax.random.normal(k4, (C,), dtype=jnp.float32)
    x_rel = jax.random.normal(k1, (N, C, L), dtype=jnp.float32)
    x_irrel = jax.random.normal(k2, (N, C, L), dtype=jnp.float32)
    out = cd_batch_norm({"rel": x_rel, "irrel": x_irrel}, gamma, beta, eps)
    out = jax.tree_util.tree_map(jax.block_until_ready, out)
    assert jnp.allclose(out["rel"], _reference_bn(x_rel, gamma, beta, eps),
                        atol=2e-5, rtol=2e-5)
    assert jnp.allclose(out["irrel"], _reference_bn(x_irrel, gamma, beta, eps),
                        atol=2e-5, rtol=2e-5)

    # --- 2) dict input, 3D, tiled two-pass path (tiny block budget forces
    #        multi-step accumulation and exercises the channel-split stats grid) -
    N2, C2, L2 = 4, 16, 512
    gamma2 = 1.0 + 0.1 * jax.random.normal(k5, (C2,), dtype=jnp.float32)
    beta2 = 0.1 * jax.random.normal(k6, (C2,), dtype=jnp.float32)
    xr2 = jax.random.normal(k7, (N2, C2, L2), dtype=jnp.float32)
    xi2 = jax.random.normal(k8, (N2, C2, L2), dtype=jnp.float32)
    out2 = cd_batch_norm({"rel": xr2, "irrel": xi2}, gamma2, beta2, eps,
                         force_tiled=True, block_budget_bytes=64 * 1024)
    out2 = jax.tree_util.tree_map(jax.block_until_ready, out2)
    assert jnp.allclose(out2["rel"], _reference_bn(xr2, gamma2, beta2, eps),
                        atol=1e-4, rtol=1e-4)
    assert jnp.allclose(out2["irrel"], _reference_bn(xi2, gamma2, beta2, eps),
                        atol=1e-4, rtol=1e-4)

    # --- 3) plain 2D (N, C) input: fused path (C on lanes, no (N,C,1) reshape) --
    x2d = jax.random.normal(k5, (8, C), dtype=jnp.float32)
    out2d = jax.block_until_ready(cd_batch_norm(x2d, gamma, beta, eps))
    assert jnp.allclose(out2d, _reference_bn(x2d, gamma, beta, eps),
                        atol=2e-5, rtol=2e-5)

    # --- 4) plain 2D (N, C) input: tiled two-pass path --------------------------
    C4 = 8
    gamma4 = 1.0 + 0.1 * jax.random.normal(k3, (C4,), dtype=jnp.float32)
    beta4 = 0.1 * jax.random.normal(k4, (C4,), dtype=jnp.float32)
    x2d_big = jax.random.normal(k6, (64, C4), dtype=jnp.float32)
    out2d_big = jax.block_until_ready(
        cd_batch_norm(x2d_big, gamma4, beta4, eps,
                      force_tiled=True, block_budget_bytes=1024))
    assert jnp.allclose(out2d_big, _reference_bn(x2d_big, gamma4, beta4, eps),
                        atol=2e-5, rtol=2e-5)

    print("KERNEL_OK")
</pallas_src>

<mosaic_0001>
module attributes {stable_mosaic.version = 11 : i64} {
  func.func @_fused_ncl_kernel(%arg0: i32, %arg1: memref<2x4x16xf32, #tpu.memory_space<vmem>>, %arg2: memref<2x4x16xf32, #tpu.memory_space<vmem>>, %arg3: memref<4x1xf32, #tpu.memory_space<vmem>>, %arg4: memref<4x1xf32, #tpu.memory_space<vmem>>, %arg5: memref<2x4x16xf32, #tpu.memory_space<vmem>>, %arg6: memref<2x4x16xf32, #tpu.memory_space<vmem>>) attributes {dimension_semantics = [#tpu.dimension_semantics<arbitrary>], iteration_bounds = array<i64: 1>, scalar_prefetch = 0 : i64, scratch_operands = 0 : i64, tpu.core_type = #tpu.core_type<tc>, window_params = [{pipeline_mode = #tpu.pipeline_mode<synchronous>, transform_indices = @transform_0, window_bounds = array<i64: 2, 4, 16>}, {pipeline_mode = #tpu.pipeline_mode<synchronous>, transform_indices = @transform_1, window_bounds = array<i64: 2, 4, 16>}, {pipeline_mode = #tpu.pipeline_mode<synchronous>, transform_indices = @transform_2, window_bounds = array<i64: 4, 1>}, {pipeline_mode = #tpu.pipeline_mode<synchronous>, transform_indices = @transform_3, window_bounds = array<i64: 4, 1>}, {pipeline_mode = #tpu.pipeline_mode<synchronous>, transform_indices = @transform_4, window_bounds = array<i64: 2, 4, 16>}, {pipeline_mode = #tpu.pipeline_mode<synchronous>, transform_indices = @transform_5, window_bounds = array<i64: 2, 4, 16>}]} {
    %c0 = arith.constant 0 : index
    %c0_0 = arith.constant 0 : index
    %0 = vector.load %arg3[%c0, %c0_0] : memref<4x1xf32, #tpu.memory_space<vmem>>, vector<4x1xf32>
    %1 = vector.shape_cast %0 : vector<4x1xf32> to vector<1x4x1xf32>
    %c0_1 = arith.constant 0 : index
    %c0_2 = arith.constant 0 : index
    %2 = vector.load %arg4[%c0_1, %c0_2] : memref<4x1xf32, #tpu.memory_space<vmem>>, vector<4x1xf32>
    %3 = vector.shape_cast %2 : vector<4x1xf32> to vector<1x4x1xf32>
    %c0_3 = arith.constant 0 : index
    %c0_4 = arith.constant 0 : index
    %c0_5 = arith.constant 0 : index
    %4 = vector.load %arg1[%c0_3, %c0_4, %c0_5] : memref<2x4x16xf32, #tpu.memory_space<vmem>>, vector<2x4x16xf32>
    %cst = arith.constant dense<0.000000e+00> : vector<2x4xf32>
    %5 = vector.multi_reduction <add>, %4, %cst [2] : vector<2x4x16xf32> to vector<2x4xf32>
    %6 = vector.shape_cast %5 : vector<2x4xf32> to vector<2x4x1xf32>
    %cst_6 = arith.constant dense<0.000000e+00> : vector<4x1xf32>
    %7 = vector.multi_reduction <add>, %6, %cst_6 [0] : vector<2x4x1xf32> to vector<4x1xf32>
    %8 = vector.shape_cast %7 : vector<4x1xf32> to vector<1x4x1xf32>
    %cst_7 = arith.constant 3.125000e-02 : f32
    %9 = vector.broadcast %cst_7 : f32 to vector<1x4x1xf32>
    %10 = arith.mulf %8, %9 : vector<1x4x1xf32>
    %11 = vector.broadcast %10 : vector<1x4x1xf32> to vector<2x4x16xf32>
    %12 = arith.subf %4, %11 : vector<2x4x16xf32>
    %13 = arith.mulf %12, %12 : vector<2x4x16xf32>
    %cst_8 = arith.constant dense<0.000000e+00> : vector<2x4xf32>
    %14 = vector.multi_reduction <add>, %13, %cst_8 [2] : vector<2x4x16xf32> to vector<2x4xf32>
    %15 = vector.shape_cast %14 : vector<2x4xf32> to vector<2x4x1xf32>
    %cst_9 = arith.constant dense<0.000000e+00> : vector<4x1xf32>
    %16 = vector.multi_reduction <add>, %15, %cst_9 [0] : vector<2x4x1xf32> to vector<4x1xf32>
    %17 = vector.shape_cast %16 : vector<4x1xf32> to vector<1x4x1xf32>
    %cst_10 = arith.constant 3.125000e-02 : f32
    %18 = vector.broadcast %cst_10 : f32 to vector<1x4x1xf32>
    %19 = arith.mulf %17, %18 : vector<1x4x1xf32>
    %cst_11 = arith.constant 9.99999974E-6 : f32
    %20 = vector.broadcast %cst_11 : f32 to vector<1x4x1xf32>
    %21 = arith.addf %19, %20 : vector<1x4x1xf32>
    %22 = math.rsqrt %21 : vector<1x4x1xf32>
    %23 = arith.mulf %1, %22 : vector<1x4x1xf32>
    %24 = vector.broadcast %23 : vector<1x4x1xf32> to vector<2x4x16xf32>
    %25 = arith.mulf %12, %24 : vector<2x4x16xf32>
    %26 = vector.broadcast %3 : vector<1x4x1xf32> to vector<2x4x16xf32>
    %27 = arith.addf %25, %26 : vector<2x4x16xf32>
    %c0_12 = arith.constant 0 : index
    %c0_13 = arith.constant 0 : index
    %c0_14 = arith.constant 0 : index
    %28 = vector.load %arg5[%c0_12, %c0_13, %c0_14] : memref<2x4x16xf32, #tpu.memory_space<vmem>>, vector<2x4x16xf32>
    tpu.vector_store %arg5[%c0_12, %c0_13, %c0_14], %27 {strides = array<i32>} : memref<2x4x16xf32, #tpu.memory_space<vmem>>, vector<2x4x16xf32>,
    %c0_15 = arith.constant 0 : index
    %c0_16 = arith.constant 0 : index
    %c0_17 = arith.constant 0 : index
    %29 = vector.load %arg2[%c0_15, %c0_16, %c0_17] : memref<2x4x16xf32, #tpu.memory_space<vmem>>, vector<2x4x16xf32>
    %cst_18 = arith.constant dense<0.000000e+00> : vector<2x4xf32>
    %30 = vector.multi_reduction <add>, %29, %cst_18 [2] : vector<2x4x16xf32> to vector<2x4xf32>
    %31 = vector.shape_cast %30 : vector<2x4xf32> to vector<2x4x1xf32>
    %cst_19 = arith.constant dense<0.000000e+00> : vector<4x1xf32>
    %32 = vector.multi_reduction <add>, %31, %cst_19 [0] : vector<2x4x1xf32> to vector<4x1xf32>
    %33 = vector.shape_cast %32 : vector<4x1xf32> to vector<1x4x1xf32>
    %cst_20 = arith.constant 3.125000e-02 : f32
    %34 = vector.broadcast %cst_20 : f32 to vector<1x4x1xf32>
    %35 = arith.mulf %33, %34 : vector<1x4x1xf32>
    %36 = vector.broadcast %35 : vector<1x4x1xf32> to vector<2x4x16xf32>
    %37 = arith.subf %29, %36 : vector<2x4x16xf32>
    %38 = arith.mulf %37, %37 : vector<2x4x16xf32>
    %cst_21 = arith.constant dense<0.000000e+00> : vector<2x4xf32>
    %39 = vector.multi_reduction <add>, %38, %cst_21 [2] : vector<2x4x16xf32> to vector<2x4xf32>
    %40 = vector.shape_cast %39 : vector<2x4xf32> to vector<2x4x1xf32>
    %cst_22 = arith.constant dense<0.000000e+00> : vector<4x1xf32>
    %41 = vector.multi_reduction <add>, %40, %cst_22 [0] : vector<2x4x1xf32> to vector<4x1xf32>
    %42 = vector.shape_cast %41 : vector<4x1xf32> to vector<1x4x1xf32>
    %cst_23 = arith.constant 3.125000e-02 : f32
    %43 = vector.broadcast %cst_23 : f32 to vector<1x4x1xf32>
    %44 = arith.mulf %42, %43 : vector<1x4x1xf32>
    %cst_24 = arith.constant 9.99999974E-6 : f32
    %45 = vector.broadcast %cst_24 : f32 to vector<1x4x1xf32>
    %46 = arith.addf %44, %45 : vector<1x4x1xf32>
    %47 = math.rsqrt %46 : vector<1x4x1xf32>
    %48 = arith.mulf %1, %47 : vector<1x4x1xf32>
    %49 = vector.broadcast %48 : vector<1x4x1xf32> to vector<2x4x16xf32>
    %50 = arith.mulf %37, %49 : vector<2x4x16xf32>
    %51 = vector.broadcast %3 : vector<1x4x1xf32> to vector<2x4x16xf32>
    %52 = arith.addf %50, %51 : vector<2x4x16xf32>
    %c0_25 = arith.constant 0 : index
    %c0_26 = arith.constant 0 : index
    %c0_27 = arith.constant 0 : index
    %53 = vector.load %arg6[%c0_25, %c0_26, %c0_27] : memref<2x4x16xf32, #tpu.memory_space<vmem>>, vector<2x4x16xf32>
    tpu.vector_store %arg6[%c0_25, %c0_26, %c0_27], %52 {strides = array<i32>} : memref<2x4x16xf32, #tpu.memory_space<vmem>>, vector<2x4x16xf32>,
    return
  }
  func.func @transform_0(%arg0: i32) -> (i32, i32, i32) {
    %c0_i32 = arith.constant 0 : i32
    %c0_i32_0 = arith.constant 0 : i32
    %c0_i32_1 = arith.constant 0 : i32
    %c0_i32_2 = arith.constant 0 : i32
    return %c0_i32, %c0_i32_0, %c0_i32_1 : i32, i32, i32
  }
  func.func @transform_1(%arg0: i32) -> (i32, i32, i32) {
    %c0_i32 = arith.constant 0 : i32
    %c0_i32_0 = arith.constant 0 : i32
    %c0_i32_1 = arith.constant 0 : i32
    %c0_i32_2 = arith.constant 0 : i32
    return %c0_i32, %c0_i32_0, %c0_i32_1 : i32, i32, i32
  }
  func.func @transform_2(%arg0: i32) -> (i32, i32) {
    %c0_i32 = arith.constant 0 : i32
    %c0_i32_0 = arith.constant 0 : i32
    %c0_i32_1 = arith.constant 0 : i32
    return %c0_i32, %c0_i32_0 : i32, i32
  }
  func.func @transform_3(%arg0: i32) -> (i32, i32) {
    %c0_i32 = arith.constant 0 : i32
    %c0_i32_0 = arith.constant 0 : i32
    %c0_i32_1 = arith.constant 0 : i32
    return %c0_i32, %c0_i32_0 : i32, i32
  }
  func.func @transform_4(%arg0: i32) -> (i32, i32, i32) {
    %c0_i32 = arith.constant 0 : i32
    %c0_i32_0 = arith.constant 0 : i32
    %c0_i32_1 = arith.constant 0 : i32
    %c0_i32_2 = arith.constant 0 : i32
    return %c0_i32, %c0_i32_0, %c0_i32_1 : i32, i32, i32
  }
  func.func @transform_5(%arg0: i32) -> (i32, i32, i32) {
    %c0_i32 = arith.constant 0 : i32
    %c0_i32_0 = arith.constant 0 : i32
    %c0_i32_1 = arith.constant 0 : i32
    %c0_i32_2 = arith.constant 0 : i32
    return %c0_i32, %c0_i32_0, %c0_i32_1 : i32, i32, i32
  }
}

</mosaic_0001>

<bundles_post_ra>
// kernel: tpu_custom_call.1
= control target key start
LH: loop header
LB: loop body
LE: loop exit
PB: predicated region body
PF: predicated region fallthrough
CT: control target
= control target key end

     0   :  { %11 = vsyncpa [#allocation3], 0  ;;  %s373_s0 = inlined_call_operand.vmem [shape: f32[2,4,16], index: 0, kind: input, shape index: {}]   ;;  %s374_s1 = inlined_call_operand.hbm [shape: f32[2,4,16], index: 1, kind: input, shape index: {}]   ;;  %s375_s2 = inlined_call_operand.vmem [shape: f32[4,1], index: 2, kind: input, shape index: {}]   ;;  %s376_s3 = inlined_call_operand.vmem [shape: f32[4,1], index: 3, kind: input, shape index: {}]   ;;  %s377_s4 = inlined_call_operand.hbm [shape: f32[2,4,16], index: 4, kind: output, shape index: {0}]   ;;  %s378_s5 = inlined_call_operand.hbm [shape: f32[2,4,16], index: 5, kind: output, shape index: {1}]  }
   0x1   :  { %12 = vsyncpa [#allocation4], 0 }
   0x2   :  { %13 = vsyncpa [#allocation7], 0  ;;  %s20_s20 = sshll.u32 %s374_s1, 4  ;;  %s272_s21 = smov [#allocation2]   ;;  %s21_s20 = int_to_ptr.hbm [resolvable:$true] %s20_s20 }
   0x3   :  { %s22_s22 = sshll.u32 %s272_s21, 4  ;;  %s273_s23 = smov 64   ;;  %s23_s22 = int_to_ptr.vmem [resolvable:$true] %s22_s22 }
   0x4   :  { %s274_s24 = smov 4  }
   0x5   :  { %28 = dma.hbm_to_vmem [thread:$0]  %s21_s20, 128, %s23_s22, [#allocation3], %s273_s23, %s273_s23, %s274_s24  }
   0x6   :  { %266 = dma.done.wait [#allocation3], 128  }
   0x7   :  { %267 = vsyncadd [#allocation3], 4294967168  ;;  %vm41_vm0 = vcmask 125952   ;;  %v95_v0 = vld [vmem:[#allocation2] sm:$0xf]  ;;  %vm48_vm1 = vcmask 1043456  }
   0x8   :  { %v39_v1 = vld [vmem:[%s373_s0] sm:$0xf]  ;;  %v97_v2 = vsel %vm41_vm0, %v95_v0, 0.0  ;;  %v96_v4 = vld [vmem:[#allocation2 + $0x4] sm:$0xf]  ;;  %v275_v32 = vmov 0  }
   0x9   :  { %v42_v3 = vsel %vm41_vm0, %v39_v1, 0.0  ;;  %98 = vadd.xlane.f32.xlu1 %v97_v2  ;;  %v40_v5 = vld [vmem:[%s373_s0 + $0x4] sm:$0xf]  ;;  %v100_v6 = vsel %vm41_vm0, %v96_v4, 0.0  ;;  %v38_v33 = vld [vmem:[%s376_s3] sm:$0xf]  ;;  %188 = vset.pattern.permute.xlu0 %v275_v32 }
   0xa   :  { %43 = vadd.xlane.f32.xlu0 %v42_v3  ;;  %v45_v7 = vsel %vm41_vm0, %v40_v5, 0.0  ;;  %189 = vset.pattern.permute.xlu1 %v275_v32  ;;  %v37_v54 = vld [vmem:[%s375_s2] sm:$0xf]  ;;  %s276_s2 = smov [#allocation5]   ;;  %s150_s8 = sshll.u32 %s377_s4, 4  ;;  %s151_s8 = int_to_ptr.hbm [resolvable:$true] %s150_s8 }
   0xb   :  { %187 = vset.pattern.permute.xlu2 %v275_v32  ;;  %s148_s30 = sshll.u32 %s276_s2, 4  ;;  %s277_s9 = smov [#allocation6]   ;;  %s149_s30 = int_to_ptr.vmem [resolvable:$true] %s148_s30 }
   0xc   :  { %s161_s10 = sshll.u32 %s277_s9, 4  ;;  %s163_s12 = sshll.u32 %s378_s5, 4  ;;  %s162_s10 = int_to_ptr.vmem [resolvable:$true] %s161_s10  ;;  %s164_s12 = int_to_ptr.hbm [resolvable:$true] %s163_s12 }
  0x11   :  { %101 = vadd.xlane.f32.xlu1 %v100_v6 }
  0x12   :  { %46 = vadd.xlane.f32.xlu0 %v45_v7 }
  0x7c   :  { %v99_v8 = vpop.xlane.xlu1 %98 }
  0x7d   :  { %v44_v9 = vpop.xlane.xlu0 %43  ;;  %v103_v13 = vsel %vm48_vm1, %v99_v8, 0.0 }
  0x7e   :  { %v49_v10 = vsel %vm48_vm1, %v44_v9, 0.0 }
  0x84   :  { %v102_v11 = vpop.xlane.xlu1 %101 }
  0x85   :  { %v47_v12 = vpop.xlane.xlu0 %46  ;;  %v104_v14 = vsel %vm48_vm1, %v102_v11, 0.0 }
  0x86   :  { %v50_v15 = vsel %vm48_vm1, %v47_v12, 0.0  ;;  %v105_v16 = vadd.f32 %v104_v14, %v103_v13 }
  0x87   :  { %v51_v17 = vadd.f32 %v50_v15, %v49_v10 }
  0x88   :  { %v106_v18 = vmul.f32 0.03125, %v105_v16 }
  0x89   :  { %v52_v19 = vmul.f32 0.03125, %v51_v17 }
  0x8a   :  { %v328_v20 = vsub.f32 %v95_v0, %v106_v18  ;;  %v330_v21 = vsub.f32 %v96_v4, %v106_v18 }
  0x8b   :  { %v332_v22 = vsub.f32 %v39_v1, %v52_v19  ;;  %v54_v26 = vsub.f32 %v40_v5, %v52_v19 }
  0x8c   :  { %v110_v23 = vmul.f32 %v330_v21, %v330_v21  ;;  %v109_v24 = vmul.f32 %v328_v20, %v328_v20 }
  0x8d   :  { %v55_v25 = vmul.f32 %v332_v22, %v332_v22  ;;  %v56_v30 = vmul.f32 %v54_v26, %v54_v26 }
  0x8e   :  { %v114_v27 = vsel %vm41_vm0, %v110_v23, 0.0  ;;  %v111_v28 = vsel %vm41_vm0, %v109_v24, 0.0 }
  0x8f   :  { %v57_v29 = vsel %vm41_vm0, %v55_v25, 0.0  ;;  %115 = vadd.xlane.f32.xlu1 %v114_v27  ;;  %112 = vadd.xlane.f32.xlu0 %v111_v28  ;;  %v60_v31 = vsel %vm41_vm0, %v56_v30, 0.0 }
  0x90   :  { %58 = vadd.xlane.f32.xlu2 %v57_v29 }
  0x98   :  { %61 = vadd.xlane.f32.xlu2 %v60_v31 }
  0xa8   :  { %88 = vperm.xlu1 %189, %v38_v33  }
 0x102   :  { %v116_v34 = vpop.xlane.xlu1 %115  ;;  %v113_v35 = vpop.xlane.xlu0 %112 }
 0x103   :  { %v118_v36 = vsel %vm48_vm1, %v116_v34, 0.0  ;;  %v59_v37 = vpop.xlane.xlu2 %58  ;;  %v117_v38 = vsel %vm48_vm1, %v113_v35, 0.0 }
 0x104   :  { %v119_v39 = vadd.f32 %v118_v36, %v117_v38  ;;  %v63_v42 = vsel %vm48_vm1, %v59_v37, 0.0 }
 0x106   :  { %v120_v40 = vmul.f32 0.03125, %v119_v39 }
 0x108   :  { %v121_v41 = vadd.f32 1e-05, %v120_v40 }
 0x10a   :  { %190 = vrsqrt.f32 %v121_v41  ;;  %vm128_vm3 = vweird.f32 %v121_v41 }
 0x10b   :  { %v62_v43 = vpop.xlane.xlu2 %61 }
 0x10c   :  { %v64_v44 = vsel %vm48_vm1, %v62_v43, 0.0 }
 0x10d   :  { %v65_v45 = vadd.f32 %v64_v44, %v63_v42 }
 0x10f   :  { %v66_v46 = vmul.f32 0.03125, %v65_v45 }
 0x110   :  { %v191_v47 = vpop.eup %190 }
 0x111   :  { %v123_v48 = vmul.f32 %v191_v47, %v121_v41  ;;  %v67_v49 = vadd.f32 1e-05, %v66_v46  ;;  %vm129_vm2 = vweird.f32 %v191_v47 }
 0x112   :  { %vm130_vm4 = vmor %vm128_vm3, %vm129_vm2 }
 0x113   :  { %v124_v50 = vmul.f32 %v191_v47, %v123_v48  ;;  %192 = vrsqrt.f32 %v67_v49  ;;  %vm74_vm6 = vweird.f32 %v67_v49 }
 0x115   :  { %v125_v51 = vmul.f32 0.5, %v124_v50 }
 0x117   :  { %v126_v52 = vsub.f32 1.5, %v125_v51 }
 0x119   :  { %v193_v53 = vpop.eup %192  ;;  %v127_v55 = vmul.f32 %v191_v47, %v126_v52 }
 0x11a   :  { %v69_v56 = vmul.f32 %v193_v53, %v67_v49  ;;  %vm75_vm5 = vweird.f32 %v193_v53  ;;  %v89_v2 = vpop.permute.xlu1 %88 }
 0x11b   :  { %v131_v57 = vsel %vm130_vm4, %v191_v47, %v127_v55  ;;  %vm76_vm7 = vmor %vm74_vm6, %vm75_vm5 }
 0x11c   :  { %v70_v58 = vmul.f32 %v193_v53, %v69_v56  ;;  %v132_v59 = vmul.f32 %v131_v57, %v37_v54 }
 0x11e   :  { %v71_v60 = vmul.f32 0.5, %v70_v58  ;;  %135 = vperm.xlu0 %188, %v132_v59  }
 0x120   :  { %v72_v61 = vsub.f32 1.5, %v71_v60 }
 0x122   :  { %v73_v62 = vmul.f32 %v193_v53, %v72_v61 }
 0x124   :  { %v77_v63 = vsel %vm76_vm7, %v193_v53, %v73_v62 }
 0x125   :  { %v78_v0 = vmul.f32 %v77_v63, %v37_v54 }
 0x127   :  { %81 = vperm.xlu2 %187, %v78_v0  }
 0x181   :  { %v82_v1 = vpop.permute.xlu2 %81 }
 0x182   :  { %v84_v3 = vmul.f32 %v82_v1, %v332_v22  ;;  %v85_v4 = vmul.f32 %v82_v1, %v54_v26 }
 0x184   :  { %v91_v5 = vadd.f32 %v89_v2, %v84_v3  ;;  %v92_v6 = vadd.f32 %v89_v2, %v85_v4 }
 0x186   :  { %93 = vst.msk [vmem:[#allocation5] sm:$0xf] %vm41_vm0, %v91_v5 }
 0x187   :  { %94 = vst.msk [vmem:[#allocation5 + $0x4] sm:$0xf] %vm41_vm0, %v92_v6 }
 0x188   :  { %156 = dma.vmem_to_hbm [thread:$0]  %s149_s30, 128, %s151_s8, [#allocation4], %s273_s23, %s273_s23, %s274_s24  }
 0x190   :  { %v136_v7 = vpop.permute.xlu0 %135 }
 0x191   :  { %v138_v8 = vmul.f32 %v136_v7, %v328_v20  ;;  %v139_v9 = vmul.f32 %v136_v7, %v330_v21 }
 0x193   :  { %v140_v10 = vadd.f32 %v138_v8, %v89_v2  ;;  %v141_v11 = vadd.f32 %v139_v9, %v89_v2 }
 0x195   :  { %142 = vst.msk [vmem:[#allocation6] sm:$0xf] %vm41_vm0, %v140_v10 }
 0x196   :  { %143 = vst.msk [vmem:[#allocation6 + $0x4] sm:$0xf] %vm41_vm0, %v141_v11 }
 0x197   :  { %169 = dma.vmem_to_hbm [thread:$0]  %s162_s10, 128, %s164_s12, [#allocation7], %s273_s23, %s273_s23, %s274_s24  }
 0x198   :  { %268 = dma.done.wait [#allocation4], 128  }
 0x199   :  { %269 = vsyncadd [#allocation4], 4294967168 }
 0x19a   :  { %270 = dma.done.wait [#allocation7], 128  }
 0x19b   :  { %271 = vsyncadd [#allocation7], 4294967168 }
 0x19c   :  { %178 = vsyncpa [#allocation3], 1 }
 0x19d   :  { %179 = vsyncpa [#allocation4], 1 }
 0x19e   :  { %180 = vsyncpa [#allocation7], 1 }

</bundles_post_ra>
